<compile_context>
chip_gen: v5e
topology: v5e:2x2
jax: 0.10.0
libtpu: 0.0.40
codegen_flags: <defaults>
</compile_context>

<pallas_src>
import functools
import math

import jax
import jax.numpy as jnp
import numpy as np
from jax.experimental import pallas as pl
from jax.experimental.pallas import tpu as pltpu


def build_pe_table(embed_dim: int, max_seq_len: int = 512) -> jnp.ndarray:
    """Reproduce the PyTorch __init__ loop exactly (fp32 buffer).

    pe[pos, i]     = sin(pos / 10000 ** (2 * i       / embed_dim))
    pe[pos, i + 1] = cos(pos / 10000 ** (2 * (i + 1) / embed_dim))
    for i in range(0, embed_dim, 2).  (The cos exponent is 2*(i+1)/embed_dim,
    faithful to the module, intentionally not the canonical Vaswani form.)
    """
    pe = np.zeros((max_seq_len, embed_dim), dtype=np.float32)
    pos = np.arange(max_seq_len, dtype=np.float64)[:, None]          # (L, 1)
    i_even = np.arange(0, embed_dim, 2, dtype=np.float64)[None, :]   # (1, D/2)
    pe[:, 0::2] = np.sin(pos / 10000.0 ** (2.0 * i_even / embed_dim))
    pe[:, 1::2] = np.cos(pos / 10000.0 ** (2.0 * (i_even + 1.0) / embed_dim))
    return jnp.asarray(pe)[None, :, :]  # (1, max_seq_len, embed_dim) fp32


# ----------------------------------------------------------------------------
# Kernel
# ----------------------------------------------------------------------------
def _pos_enc_kernel(x_ref, pe_ref, o_ref, *, scale):
    # x_ref : (bB, tC) block of the (B_pad, SD_pad) view of x
    # pe_ref: (1, tC) fp32 positional-encoding slab, broadcast over rows
    x = x_ref[...].astype(jnp.float32)
    o_ref[...] = (x * scale + pe_ref[...]).astype(o_ref.dtype)


# ----------------------------------------------------------------------------
# Block-size selection (joint budget)
# ----------------------------------------------------------------------------
def _round_up(n: int, m: int) -> int:
    return (n + m - 1) // m * m


def _largest_divisor(n: int, granule: int, cap: int):
    """Largest d with d % granule == 0, n % d == 0, d <= cap; None if none."""
    d = min(cap, n) // granule * granule
    while d >= granule:
        if n % d == 0:
            return d
        d -= granule
    return None


def _select_blocks(B: int, SD_pad: int, itemsize: int, block_target_bytes: int):
    """Pick (bB, tC, B_pad) such that bB*tC*itemsize <= block_target_bytes
    (modulo the hard floors of one packed-sublane row tile / one 128-lane
    column tile), never falling back to the full batch extent."""
    sub_pack = 8 * max(1, 4 // itemsize)          # 8 f32 / 16 bf16 / 32 int8
    target_elems = max(128 * sub_pack, block_target_bytes // itemsize)

    # Column block first, budgeted assuming the minimum row block (sub_pack),
    # so the joint product bB*tC never exceeds the target.
    col_cap = max(128, target_elems // sub_pack)
    tC = _largest_divisor(SD_pad, 128, col_cap) or 128   # 128 always divides SD_pad

    # Prefer >= 2 column blocks for non-trivial tensors so both v7x
    # TensorCores (megacore partitioner) get work.
    if SD_pad // tC < 2 and SD_pad >= 256 and B * SD_pad * itemsize >= (1 << 20):
        halved = _largest_divisor(SD_pad, 128, SD_pad // 2)
        if halved is not None:
            tC = halved

    # Row block from whatever budget remains (joint, not per-axis).
    row_cap = max(1, target_elems // tC)
    if B <= row_cap:
        bB, B_pad = B, B                           # full extent: always legal
    else:
        bB = _largest_divisor(B, sub_pack, row_cap)
        if bB is None:
            # No clean divisor: never fall back to full B; pad the batch.
            bB = max(sub_pack, (row_cap // sub_pack) * sub_pack)
            B_pad = _round_up(B, bB)
        else:
            B_pad = B
    return bB, tC, B_pad


# ----------------------------------------------------------------------------
# Wrapper
# ----------------------------------------------------------------------------
def _positional_encoder_impl(
    x: jnp.ndarray,
    pe: jnp.ndarray,
    *,
    block_target_bytes: int = 4 << 20,   # ~4 MiB block -> ~18 MiB resident, OK on all gens
) -> jnp.ndarray:
    """x: (B, S, D); pe: (1, max_seq_len, D) fp32. Returns (B, S, D) in x.dtype."""
    B, S, D = x.shape
    max_seq_len = pe.shape[1]
    if S > max_seq_len:
        raise ValueError(f"seq_len {S} exceeds positional table length {max_seq_len}")

    scale = math.sqrt(D)
    itemsize = jnp.dtype(x.dtype).itemsize
    SD = S * D
    SD_pad = _round_up(SD, 128)

    # Lane-dense 2-D views: collapse (S, D) into one wide lane-major axis.
    x2 = x.reshape(B, SD)
    pe2 = pe[:, :S, :].reshape(1, SD).astype(jnp.float32)   # keep fp32 (torch buffer semantics)
    if SD_pad != SD:
        x2 = jnp.pad(x2, ((0, 0), (0, SD_pad - SD)))
        pe2 = jnp.pad(pe2, ((0, 0), (0, SD_pad - SD)))

    bB, tC, B_pad = _select_blocks(B, SD_pad, itemsize, block_target_bytes)
    if B_pad != B:
        x2 = jnp.pad(x2, ((0, B_pad - B), (0, 0)))

    # Column axis OUTER, batch axis INNER: pe's block index depends only on
    # the outer axis, so consecutive steps reuse the same pe block and Pallas
    # skips the redundant DMA.
    grid = (SD_pad // tC, B_pad // bB)

    # Explicit VMEM budget from the actual resident footprint:
    # 2x double-buffered x block + 2x out block + 2x fp32 pe block, + margin.
    resident = 4 * bB * tC * itemsize + 2 * tC * 4
    vmem_limit = int(min(max(resident + (2 << 20), 16 << 20), 48 << 20))

    kernel = functools.partial(_pos_enc_kernel, scale=scale)

    out2 = pl.pallas_call(
        kernel,
        out_shape=jax.ShapeDtypeStruct((B_pad, SD_pad), x.dtype),
        grid=grid,
        in_specs=[
            pl.BlockSpec((bB, tC), lambda c, b: (b, c)),
            pl.BlockSpec((1, tC), lambda c, b: (0, c)),   # constant along inner axis
        ],
        out_specs=pl.BlockSpec((bB, tC), lambda c, b: (b, c)),
        compiler_params=pltpu.CompilerParams(
            dimension_semantics=("parallel", "parallel"),
            vmem_limit_bytes=vmem_limit,
        ),
    )(x2, pe2)

    if B_pad != B or SD_pad != SD:
        out2 = out2[:B, :SD]
    return out2.reshape(B, S, D)


# jit so the pe slice/cast/pad fuses instead of standalone eager copy passes.
positional_encoder = jax.jit(_positional_encoder_impl,
                             static_argnames=("block_target_bytes",))


def _reference(x, pe):
    B, S, D = x.shape
    return (x.astype(jnp.float32) * math.sqrt(D)
            + pe[:, :S, :].astype(jnp.float32)).astype(x.dtype)


if __name__ == "__main__":
    max_seq_len = 512
    key = jax.random.PRNGKey(0)
    k1, k2, k3 = jax.random.split(key, 3)

    # --- 1. small demo shape (matches the module's convention) --------------
    B, S, D = 2, 8, 32
    x = jax.random.normal(k1, (B, S, D), dtype=jnp.float32)
    pe = build_pe_table(D, max_seq_len)
    out = jax.block_until_ready(positional_encoder(x, pe))
    np.testing.assert_allclose(
        np.asarray(out), np.asarray(_reference(x, pe)), rtol=1e-6, atol=1e-6
    )

    # --- 2. force a multi-block grid (column outer, batch inner) ------------
    B2, S2, D2 = 16, 8, 128
    x2 = jax.random.normal(k2, (B2, S2, D2), dtype=jnp.float32)
    pe2 = build_pe_table(D2, max_seq_len)
    out2 = jax.block_until_ready(
        positional_encoder(x2, pe2, block_target_bytes=32 * 1024)
    )
    np.testing.assert_allclose(
        np.asarray(out2), np.asarray(_reference(x2, pe2)), rtol=1e-6, atol=1e-6
    )

    # --- 3. exercise the lane-padding path (S*D not a multiple of 128) ------
    B3, S3, D3 = 4, 5, 24
    x3 = jax.random.normal(k3, (B3, S3, D3), dtype=jnp.float32)
    pe3 = build_pe_table(D3, max_seq_len)
    out3 = jax.block_until_ready(positional_encoder(x3, pe3))
    np.testing.assert_allclose(
        np.asarray(out3), np.asarray(_reference(x3, pe3)), rtol=1e-6, atol=1e-6
    )

    print("KERNEL_OK")
</pallas_src>

<mosaic_0001>
module attributes {stable_mosaic.version = 11 : i64} {
  func.func @_pos_enc_kernel(%arg0: i32, %arg1: i32, %arg2: memref<2x256xf32, #tpu.memory_space<vmem>>, %arg3: memref<1x256xf32, #tpu.memory_space<vmem>>, %arg4: memref<2x256xf32, #tpu.memory_space<vmem>>) attributes {dimension_semantics = [#tpu.dimension_semantics<parallel>, #tpu.dimension_semantics<parallel>], iteration_bounds = array<i64: 1, 1>, scalar_prefetch = 0 : i64, scratch_operands = 0 : i64, tpu.core_type = #tpu.core_type<tc>, window_params = [{transform_indices = @transform_0, window_bounds = array<i64: 2, 256>}, {transform_indices = @transform_1, window_bounds = array<i64: 1, 256>}, {transform_indices = @transform_2, window_bounds = array<i64: 2, 256>}]} {
    %c0 = arith.constant 0 : index
    %c0_0 = arith.constant 0 : index
    %0 = vector.load %arg2[%c0, %c0_0] : memref<2x256xf32, #tpu.memory_space<vmem>>, vector<2x256xf32>
    %cst = arith.constant 5.65685415 : f32
    %1 = vector.broadcast %cst : f32 to vector<2x256xf32>
    %2 = arith.mulf %0, %1 : vector<2x256xf32>
    %c0_1 = arith.constant 0 : index
    %c0_2 = arith.constant 0 : index
    %3 = vector.load %arg3[%c0_1, %c0_2] : memref<1x256xf32, #tpu.memory_space<vmem>>, vector<1x256xf32>
    %4 = vector.broadcast %3 : vector<1x256xf32> to vector<2x256xf32>
    %5 = arith.addf %2, %4 : vector<2x256xf32>
    %c0_3 = arith.constant 0 : index
    %c0_4 = arith.constant 0 : index
    %6 = vector.load %arg4[%c0_3, %c0_4] : memref<2x256xf32, #tpu.memory_space<vmem>>, vector<2x256xf32>
    tpu.vector_store %arg4[%c0_3, %c0_4], %5 {strides = array<i32>} : memref<2x256xf32, #tpu.memory_space<vmem>>, vector<2x256xf32>,
    return
  }
  func.func @transform_0(%arg0: i32, %arg1: i32) -> (i32, i32) {
    %c0_i32 = arith.constant 0 : i32
    return %arg1, %arg0 : i32, i32
  }
  func.func @transform_1(%arg0: i32, %arg1: i32) -> (i32, i32) {
    %c0_i32 = arith.constant 0 : i32
    %c0_i32_0 = arith.constant 0 : i32
    return %c0_i32, %arg0 : i32, i32
  }
  func.func @transform_2(%arg0: i32, %arg1: i32) -> (i32, i32) {
    %c0_i32 = arith.constant 0 : i32
    return %arg1, %arg0 : i32, i32
  }
}

</mosaic_0001>

<bundles_post_ra>
// kernel: _positional_encoder_impl.1
= control target key start
LH: loop header
LB: loop body
LE: loop exit
PB: predicated region body
PF: predicated region fallthrough
CT: control target
= control target key end

     0   :  { %vm18_vm0 = vcmask 1041408   ;;  %s51_s0 = inlined_call_operand.vmem [shape: f32[2,256], index: 0, kind: input, shape index: {}]   ;;  %s52_s1 = inlined_call_operand.vmem [shape: f32[1,256], index: 1, kind: input, shape index: {}]   ;;  %s53_s2 = inlined_call_operand.vmem [shape: f32[2,256], index: 2, kind: output, shape index: {}]  }
   0x1   :  { %v11_v0 = vld [vmem:[%s51_s0] sm:$0xf] }
   0x2   :  { %v13_v1 = vld [vmem:[%s52_s1] sm:$0x3]  ;;  %v12_v4 = vmul.f32 5.656854, %v11_v0 }
   0x3   :  { %v15_v2 = vperm.slane %v13_v1, 0  ;;  %v16_v3 = vperm.slane %v13_v1, 1 }
   0x5   :  { %v17_v5 = vrot.slane %v16_v3, 6 }
   0x7   :  { %v19_v6 = vsel %vm18_vm0, %v15_v2, %v17_v5 }
   0x8   :  { %v21_v7 = vadd.f32 %v19_v6, %v12_v4 }
   0xa   :  { %22 = vst [vmem:[%s53_s2] sm:$0xf] %v21_v7 }

</bundles_post_ra>
